<compile_context>
chip_gen: v6e
topology: v6e:2x2x1
jax: 0.10.0
libtpu: 0.0.40
codegen_flags: <defaults>
</compile_context>

<pallas_src>
import functools

import jax
import jax.numpy as jnp
from jax.experimental import pallas as pl
from jax.experimental.pallas import tpu as pltpu


def _round_up(x, m):
    return ((x + m - 1) // m) * m


def decoder_kernel(z_ref, w1_ref, b1_ref, w2_ref, b2_ref, w3_ref, b3_ref, out_ref):
    """One batch tile of: sigmoid(fc3(relu(fc2(relu(fc1(z))))))."""
    wdt = w1_ref.dtype  # MXU operand dtype (bf16 by default); accumulation stays f32.

    # fc1 + relu
    h = jnp.dot(z_ref[...].astype(wdt), w1_ref[...],
                preferred_element_type=jnp.float32)
    h = jnp.maximum(h + b1_ref[...], 0.0)

    # fc2 + relu
    h = jnp.dot(h.astype(wdt), w2_ref[...],
                preferred_element_type=jnp.float32)
    h = jnp.maximum(h + b2_ref[...], 0.0)

    # fc3 + sigmoid (exp and the reciprocal both stay on the EUP slot)
    h = jnp.dot(h.astype(wdt), w3_ref[...],
                preferred_element_type=jnp.float32)
    logits = h + b3_ref[...]
    y = pl.reciprocal(1.0 + jnp.exp(-logits), approx=True)
    out_ref[...] = y.astype(out_ref.dtype)


_VMEM_BUDGET = 44 * 1024 * 1024  # keep tiles comfortably inside v7x's 64 MiB VMEM


def _vmem_estimate(tile_b, z_dim, h1, h2, out_dim, z_bytes, w_bytes, out_bytes):
    z_blk = 2 * tile_b * z_dim * z_bytes                        # double-buffered input stream
    o_blk = 2 * tile_b * out_dim * out_bytes                    # double-buffered output stream
    wts = 2 * (z_dim * h1 + h1 * h2 + h2 * out_dim) * w_bytes   # resident weights (dbl-buffered)
    bias = 2 * (h1 + h2 + out_dim) * 4
    live = tile_b * (max(h1, h2) + out_dim) * 4                 # f32 intermediates in flight
    return z_blk + o_blk + wts + bias + live


def _select_tile_b(tile_b, B, z_dim, h1, h2, out_dim, z_bytes, w_bytes, out_bytes):
    tile_b = _round_up(max(8, min(int(tile_b), _round_up(B, 8))), 8)
    # v7x megacore: make sure the batch grid has >= 2 blocks when the batch allows it.
    while pl.cdiv(B, tile_b) < 2 and tile_b > 8:
        tile_b = _round_up(max(tile_b // 2, 8), 8)
    # Cap the working set so it fits v7x's 64 MiB VMEM (no-op on v5e/v6e's 128 MiB).
    while (_vmem_estimate(tile_b, z_dim, h1, h2, out_dim, z_bytes, w_bytes, out_bytes)
           > _VMEM_BUDGET and tile_b > 8):
        tile_b = _round_up(max(tile_b // 2, 8), 8)
    return tile_b


def decoder_forward(z, params, *, tile_b=2048, out_dtype=jnp.float32):
    """z: [B, z_dim].  params: w1,w2,w3 pre-transposed to [in, out] and already cast
    to the desired MXU operand dtype (see prepare_params); b1,b2,b3 as [1, out] f32."""
    B, z_dim = z.shape
    h1 = params["w1"].shape[1]
    h2 = params["w2"].shape[1]
    out_dim = params["w3"].shape[1]

    z_bytes = z.dtype.itemsize
    w_bytes = params["w1"].dtype.itemsize
    out_bytes = jnp.dtype(out_dtype).itemsize

    tile_b = _select_tile_b(tile_b, B, z_dim, h1, h2, out_dim,
                            z_bytes, w_bytes, out_bytes)
    grid = (pl.cdiv(B, tile_b),)

    vmem_limit = _vmem_estimate(tile_b, z_dim, h1, h2, out_dim,
                                z_bytes, w_bytes, out_bytes)
    vmem_limit = min(64 * 1024 * 1024,
                     max(16 * 1024 * 1024, int(vmem_limit) + 8 * 1024 * 1024))

    # Weight/bias blocks use constant index_maps, so the pipeline re-uses the
    # same VMEM block across all batch tiles (no per-step re-DMA).  At these
    # weight sizes the default double buffer is negligible, so we skip
    # pipeline_mode=pl.Buffered(1).
    out = pl.pallas_call(
        decoder_kernel,
        out_shape=jax.ShapeDtypeStruct((B, out_dim), out_dtype),
        grid_spec=pltpu.PrefetchScalarGridSpec(
            num_scalar_prefetch=0,
            grid=grid,
            in_specs=[
                # streamed batch tile (ragged last block: OOB rows are never stored)
                pl.BlockSpec((tile_b, z_dim), lambda i: (i, 0)),
                # resident weights / biases (full-dim blocks, no padding)
                pl.BlockSpec((z_dim, h1), lambda i: (0, 0)),
                pl.BlockSpec((1, h1), lambda i: (0, 0)),
                pl.BlockSpec((h1, h2), lambda i: (0, 0)),
                pl.BlockSpec((1, h2), lambda i: (0, 0)),
                pl.BlockSpec((h2, out_dim), lambda i: (0, 0)),
                pl.BlockSpec((1, out_dim), lambda i: (0, 0)),
            ],
            out_specs=pl.BlockSpec((tile_b, out_dim), lambda i: (i, 0)),
        ),
        compiler_params=pltpu.CompilerParams(
            dimension_semantics=("parallel",),   # shards batch grid on v7x's 2 TCs
            vmem_limit_bytes=vmem_limit,
        ),
    )(z, params["w1"], params["b1"], params["w2"], params["b2"],
      params["w3"], params["b3"])
    return out


def init_params(key, z_dim, hidden_1, hidden_2, out_dim=784):
    """Deterministic init mimicking nn.Linear's uniform(-1/sqrt(fan_in), 1/sqrt(fan_in))."""
    def linear(k, fan_in, fan_out):
        kw, kb = jax.random.split(k)
        bound = 1.0 / jnp.sqrt(fan_in)
        w = jax.random.uniform(kw, (fan_in, fan_out), jnp.float32, -bound, bound)
        b = jax.random.uniform(kb, (1, fan_out), jnp.float32, -bound, bound)
        return w, b

    k1, k2, k3 = jax.random.split(key, 3)
    w1, b1 = linear(k1, z_dim, hidden_1)
    w2, b2 = linear(k2, hidden_1, hidden_2)
    w3, b3 = linear(k3, hidden_2, out_dim)
    return {"w1": w1, "b1": b1, "w2": w2, "b2": b2, "w3": w3, "b3": b3}


def prepare_params(params, compute_dtype=jnp.bfloat16):
    """One-time cast of the weights to the MXU operand dtype (biases stay f32).
    Done outside the per-call forward so there is no cast/pad traffic on every call."""
    return {
        "w1": params["w1"].astype(compute_dtype),
        "b1": params["b1"].astype(jnp.float32),
        "w2": params["w2"].astype(compute_dtype),
        "b2": params["b2"].astype(jnp.float32),
        "w3": params["w3"].astype(compute_dtype),
        "b3": params["b3"].astype(jnp.float32),
    }


def decoder_ref(z, p):
    """Pure-JAX f32 reference for correctness check."""
    h1 = jnp.maximum(z @ p["w1"] + p["b1"], 0.0)
    h2 = jnp.maximum(h1 @ p["w2"] + p["b2"], 0.0)
    return jax.nn.sigmoid(h2 @ p["w3"] + p["b3"])


if __name__ == "__main__":
    key = jax.random.PRNGKey(0)
    k_param, k_z = jax.random.split(key)

    # Small shapes; B=20 with the auto-selected tile (16) exercises a 2-step
    # grid with a ragged (partial) last batch block and masked 784-wide stores.
    B, Z_DIM, H1, H2 = 20, 16, 32, 64
    params = init_params(k_param, Z_DIM, H1, H2)
    z = jax.random.normal(k_z, (B, Z_DIM), jnp.float32)

    ref = decoder_ref(z, params)

    # f32 MXU-operand path (tight-ish tolerance; approx EUP reciprocal in the epilogue).
    p_f32 = prepare_params(params, jnp.float32)
    fwd_f32 = jax.jit(functools.partial(decoder_forward, out_dtype=jnp.float32))
    out_f32 = jax.block_until_ready(fwd_f32(z, p_f32))
    assert out_f32.shape == (B, 784), out_f32.shape
    assert jnp.allclose(out_f32, ref, atol=5e-3), "f32 mismatch vs reference"

    # bf16 MXU-operand path (default for v6e/v7x), f32 output store.
    p_bf16 = prepare_params(params, jnp.bfloat16)
    fwd_bf16 = jax.jit(functools.partial(decoder_forward, out_dtype=jnp.float32))
    out_bf16 = jax.block_until_ready(fwd_bf16(z, p_bf16))
    assert out_bf16.shape == (B, 784), out_bf16.shape
    assert jnp.allclose(out_bf16, ref, atol=3e-2), "bf16 mismatch vs reference"

    # bf16 output store (halves the dominant HBM write stream if downstream tolerates it).
    fwd_bf16_out = jax.jit(functools.partial(decoder_forward, out_dtype=jnp.bfloat16))
    out_bf16_o = jax.block_until_ready(fwd_bf16_out(z, p_bf16))
    assert out_bf16_o.shape == (B, 784), out_bf16_o.shape
    assert jnp.allclose(out_bf16_o.astype(jnp.float32), ref, atol=3e-2), "bf16-out mismatch"

    print("KERNEL_OK")
</pallas_src>

<mosaic_0001>
module attributes {stable_mosaic.version = 11 : i64} {
  func.func @decoder_kernel(%arg0: i32, %arg1: memref<16x16xf32, #tpu.memory_space<vmem>>, %arg2: memref<16x32xf32, #tpu.memory_space<vmem>>, %arg3: memref<1x32xf32, #tpu.memory_space<vmem>>, %arg4: memref<32x64xf32, #tpu.memory_space<vmem>>, %arg5: memref<1x64xf32, #tpu.memory_space<vmem>>, %arg6: memref<64x784xf32, #tpu.memory_space<vmem>>, %arg7: memref<1x784xf32, #tpu.memory_space<vmem>>, %arg8: memref<16x784xf32, #tpu.memory_space<vmem>>) attributes {dimension_semantics = [#tpu.dimension_semantics<parallel>], iteration_bounds = array<i64: 2>, scalar_prefetch = 0 : i64, scratch_operands = 0 : i64, tpu.core_type = #tpu.core_type<tc>, window_params = [{transform_indices = @transform_0, window_bounds = array<i64: 16, 16>}, {pipeline_mode = #tpu.pipeline_mode<synchronous>, transform_indices = @transform_1, window_bounds = array<i64: 16, 32>}, {pipeline_mode = #tpu.pipeline_mode<synchronous>, transform_indices = @transform_2, window_bounds = array<i64: 1, 32>}, {pipeline_mode = #tpu.pipeline_mode<synchronous>, transform_indices = @transform_3, window_bounds = array<i64: 32, 64>}, {pipeline_mode = #tpu.pipeline_mode<synchronous>, transform_indices = @transform_4, window_bounds = array<i64: 1, 64>}, {pipeline_mode = #tpu.pipeline_mode<synchronous>, transform_indices = @transform_5, window_bounds = array<i64: 64, 784>}, {pipeline_mode = #tpu.pipeline_mode<synchronous>, transform_indices = @transform_6, window_bounds = array<i64: 1, 784>}, {transform_indices = @transform_7, window_bounds = array<i64: 16, 784>}]} {
    %c0 = arith.constant 0 : index
    %c0_0 = arith.constant 0 : index
    %0 = vector.load %arg1[%c0, %c0_0] : memref<16x16xf32, #tpu.memory_space<vmem>>, vector<16x16xf32>
    %c0_1 = arith.constant 0 : index
    %c0_2 = arith.constant 0 : index
    %1 = vector.load %arg2[%c0_1, %c0_2] : memref<16x32xf32, #tpu.memory_space<vmem>>, vector<16x32xf32>
    %cst = arith.constant dense<0.000000e+00> : vector<16x32xf32>
    %2 = tpu.matmul %0, %1, %cst {dimension_numbers = #tpu.dot_dimension_numbers<[1], [0], [0], [1], [0, 0, 1, 1], [], []>} : vector<16x16xf32>, vector<16x32xf32>, vector<16x32xf32> -> vector<16x32xf32>
    %c0_3 = arith.constant 0 : index
    %c0_4 = arith.constant 0 : index
    %3 = vector.load %arg3[%c0_3, %c0_4] : memref<1x32xf32, #tpu.memory_space<vmem>>, vector<1x32xf32>
    %4 = vector.broadcast %3 : vector<1x32xf32> to vector<16x32xf32>
    %5 = arith.addf %2, %4 : vector<16x32xf32>
    %cst_5 = arith.constant 0.000000e+00 : f32
    %6 = vector.broadcast %cst_5 : f32 to vector<16x32xf32>
    %7 = arith.maximumf %5, %6 : vector<16x32xf32>
    %c0_6 = arith.constant 0 : index
    %c0_7 = arith.constant 0 : index
    %8 = vector.load %arg4[%c0_6, %c0_7] : memref<32x64xf32, #tpu.memory_space<vmem>>, vector<32x64xf32>
    %cst_8 = arith.constant dense<0.000000e+00> : vector<16x64xf32>
    %9 = tpu.matmul %7, %8, %cst_8 {dimension_numbers = #tpu.dot_dimension_numbers<[1], [0], [0], [1], [0, 0, 1, 1], [], []>} : vector<16x32xf32>, vector<32x64xf32>, vector<16x64xf32> -> vector<16x64xf32>
    %c0_9 = arith.constant 0 : index
    %c0_10 = arith.constant 0 : index
    %10 = vector.load %arg5[%c0_9, %c0_10] : memref<1x64xf32, #tpu.memory_space<vmem>>, vector<1x64xf32>
    %11 = vector.broadcast %10 : vector<1x64xf32> to vector<16x64xf32>
    %12 = arith.addf %9, %11 : vector<16x64xf32>
    %cst_11 = arith.constant 0.000000e+00 : f32
    %13 = vector.broadcast %cst_11 : f32 to vector<16x64xf32>
    %14 = arith.maximumf %12, %13 : vector<16x64xf32>
    %c0_12 = arith.constant 0 : index
    %c0_13 = arith.constant 0 : index
    %15 = vector.load %arg6[%c0_12, %c0_13] : memref<64x784xf32, #tpu.memory_space<vmem>>, vector<64x784xf32>
    %cst_14 = arith.constant dense<0.000000e+00> : vector<16x784xf32>
    %16 = tpu.matmul %14, %15, %cst_14 {dimension_numbers = #tpu.dot_dimension_numbers<[1], [0], [0], [1], [0, 0, 1, 1], [], []>} : vector<16x64xf32>, vector<64x784xf32>, vector<16x784xf32> -> vector<16x784xf32>
    %c0_15 = arith.constant 0 : index
    %c0_16 = arith.constant 0 : index
    %17 = vector.load %arg7[%c0_15, %c0_16] : memref<1x784xf32, #tpu.memory_space<vmem>>, vector<1x784xf32>
    %18 = vector.broadcast %17 : vector<1x784xf32> to vector<16x784xf32>
    %19 = arith.addf %16, %18 : vector<16x784xf32>
    %cst_17 = arith.constant 0.000000e+00 : f32
    %20 = vector.broadcast %cst_17 : f32 to vector<16x784xf32>
    %21 = arith.subf %20, %19 : vector<16x784xf32>
    %22 = math.exp %21 : vector<16x784xf32>
    %cst_18 = arith.constant 1.000000e+00 : f32
    %23 = vector.broadcast %cst_18 : f32 to vector<16x784xf32>
    %24 = arith.addf %23, %22 : vector<16x784xf32>
    %25 = tpu.reciprocal %24 {approx = true} : vector<16x784xf32> -> vector<16x784xf32>
    %c0_19 = arith.constant 0 : index
    %c0_20 = arith.constant 0 : index
    %26 = vector.load %arg8[%c0_19, %c0_20] : memref<16x784xf32, #tpu.memory_space<vmem>>, vector<16x784xf32>
    tpu.vector_store %arg8[%c0_19, %c0_20], %25 {strides = array<i32>} : memref<16x784xf32, #tpu.memory_space<vmem>>, vector<16x784xf32>,
    return
  }
  func.func @transform_0(%arg0: i32) -> (i32, i32) {
    %c0_i32 = arith.constant 0 : i32
    %c0_i32_0 = arith.constant 0 : i32
    return %arg0, %c0_i32 : i32, i32
  }
  func.func @transform_1(%arg0: i32) -> (i32, i32) {
    %c0_i32 = arith.constant 0 : i32
    %c0_i32_0 = arith.constant 0 : i32
    %c0_i32_1 = arith.constant 0 : i32
    return %c0_i32, %c0_i32_0 : i32, i32
  }
  func.func @transform_2(%arg0: i32) -> (i32, i32) {
    %c0_i32 = arith.constant 0 : i32
    %c0_i32_0 = arith.constant 0 : i32
    %c0_i32_1 = arith.constant 0 : i32
    return %c0_i32, %c0_i32_0 : i32, i32
  }
  func.func @transform_3(%arg0: i32) -> (i32, i32) {
    %c0_i32 = arith.constant 0 : i32
    %c0_i32_0 = arith.constant 0 : i32
    %c0_i32_1 = arith.constant 0 : i32
    return %c0_i32, %c0_i32_0 : i32, i32
  }
  func.func @transform_4(%arg0: i32) -> (i32, i32) {
    %c0_i32 = arith.constant 0 : i32
    %c0_i32_0 = arith.constant 0 : i32
    %c0_i32_1 = arith.constant 0 : i32
    return %c0_i32, %c0_i32_0 : i32, i32
  }
  func.func @transform_5(%arg0: i32) -> (i32, i32) {
    %c0_i32 = arith.constant 0 : i32
    %c0_i32_0 = arith.constant 0 : i32
    %c0_i32_1 = arith.constant 0 : i32
    return %c0_i32, %c0_i32_0 : i32, i32
  }
  func.func @transform_6(%arg0: i32) -> (i32, i32) {
    %c0_i32 = arith.constant 0 : i32
    %c0_i32_0 = arith.constant 0 : i32
    %c0_i32_1 = arith.constant 0 : i32
    return %c0_i32, %c0_i32_0 : i32, i32
  }
  func.func @transform_7(%arg0: i32) -> (i32, i32) {
    %c0_i32 = arith.constant 0 : i32
    %c0_i32_0 = arith.constant 0 : i32
    return %arg0, %c0_i32 : i32, i32
  }
}

</mosaic_0001>

<bundles_post_ra>
// kernel: decoder_forward.1
= control target key start
LH: loop header
LB: loop body
LE: loop exit
PB: predicated region body
PF: predicated region fallthrough
CT: control target
= control target key end

     0   :  { %12 = vsyncpa [#allocation3], 0  ;;  %s1792_s0 = inlined_call_operand.vmem [shape: f32[20,16], index: 0, kind: input, shape index: {}]   ;;  %s1793_s1 = inlined_call_operand.vmem [shape: f32[16,32], index: 1, kind: input, shape index: {}]   ;;  %s1794_s2 = inlined_call_operand.vmem [shape: f32[1,32], index: 2, kind: input, shape index: {}]   ;;  %s1795_s3 = inlined_call_operand.vmem [shape: f32[32,64], index: 3, kind: input, shape index: {}]   ;;  %s1796_s4 = inlined_call_operand.hbm [shape: f32[1,64], index: 4, kind: input, shape index: {}]   ;;  %s1797_s5 = inlined_call_operand.hbm [shape: f32[64,784], index: 5, kind: input, shape index: {}]   ;;  %s1798_s6 = inlined_call_operand.hbm [shape: f32[1,784], index: 6, kind: input, shape index: {}]   ;;  %s1799_s7 = inlined_call_operand.hbm [shape: f32[20,784], index: 7, kind: output, shape index: {}]  }
   0x1   :  { %13 = vsyncpa [#allocation6], 0 }
   0x2   :  { %14 = vsyncpa [#allocation4], 0 }
   0x3   :  { %16 = vsyncpa [#allocation4 + $0x1], 0  ;;  %s1561_s24 = smov 0   ;;  %s1563_s25 = smov 0  }
   0x4   :  { %s1565_s26 = smov 0   ;;  %s1567_s27 = smov 0  }
   0x5 LB: > { %s1582_s28 = sadd.s32 4294967295, %s1510_s27   ;;  %s1140_s29 = sadd.s32 4294967294, %s1510_s27   ;;  %s1510_s27 = sphi %s1567_s27, %s1813_s27   ;;  %s1506_s26 = sphi %s1565_s26, %s1812_s26   ;;  %s1502_s25 = sphi %s1563_s25, %s1811_s25   ;;  %s1498_s24 = sphi %s1561_s24, %s1810_s24  }
   0x6   : > { %s1586_s30 = sadd.s32 1, %s1510_s27   ;;  %s181_s8 = sadd.s32 1, %s1506_s26 }
   0x7   : > { %s178_s9 = ssub.s32 %s1510_s27, %s1586_s30  ;;  %p191_p0 = scmp.ne.s32.totalorder %s1506_s26, %s1502_s25 }
   0x8   : > { %p179_p1 = scmp.eq.s32.totalorder %s178_s9, 0  ;;  %p192_p2 = scmp.eq.s32.totalorder %s1582_s28, 1 }
   0x9   : > { %p197_p3 = scmp.ne.s32.totalorder %s1502_s25, %s1498_s24  ;;  %p198_p4 = scmp.eq.s32.totalorder %s1140_s29, 1 }
   0xa   : > { %s1597_s10 = scalar_select %p179_p1, %s1506_s26, %s181_s8  }
   0xb   : > { %p1599_p5 = por %p192_p2, %p191_p0  ;;  %p1603_p6 = por %p198_p4, %p197_p3 }
   0xc   : > { %p1141_p7 = scmp.ge.s32.totalorder %s1510_s27, 1  ;;  %p205_p8 = scmp.lt.s32.totalorder %s1510_s27, 3 }
   0xd   : > { %s1802_s12 = scalar_select %p1603_p6, 1, 0 }
   0xe   : > { %p1800_p9 = scmp.eq.s32.totalorder %s1582_s28, 0  ;;  %p1610_p10 = pnand %p1141_p7, %p205_p8 }
   0xf   : > { %s1512_s14 = smov [#allocation5]   ;;  %s1513_s17 = smov [#allocation2]  }
  0x10   : > { %s237_s15 = sshll.u32 %s1512_s14, 4  ;;  %p1247_p11 = pneg %p1610_p10  ;;  %s238_s15 = int_to_ptr.vmem [resolvable:$true] %s237_s15 }
  0x11   : > { %s227_s18 = sshll.u32 %s1513_s17, 4  ;;  %s1514_s19 = smov [#allocation7]   ;;  %s228_s18 = int_to_ptr.vmem [resolvable:$true] %s227_s18 }
  0x12   : > { %p1618_p12 = pnand %p1800_p9, %p1247_p11  ;;  %s251_s20 = sshll.u32 %s1514_s19, 4  ;;  %s252_s20 = int_to_ptr.vmem [resolvable:$true] %s251_s20 }
  0x13   : > { %s1375_s21 = scalar_lea.vmem %s238_s15, 7168  ;;  %p1383_p3 = scmp.lt.s32.totalorder %s238_s15, %s238_s15 }
  0x14   : > { %p1366_p13 = pneg %p1618_p12  ;;  %p1376_p0 = scmp.ne.s32.totalorder %s238_s15, %s1375_s21 }
  0x15   : > { %p1384_p4 = scmp.lt.s32.totalorder %s1375_s21, %s1375_s21 }
  0x16   : > { %p1378_p1 = pnand %p1376_p0, %p1366_p13 }
  0x17   : > { %p1385_p7 = por %p1384_p4, %p1383_p3 }
  0x18   : > { %p1379_p2 = pneg %p1378_p1 }
  0x1a   : > { %p1386_p8 = pnand %p1385_p7, %p1379_p2 }
  0x1c   : > { %1389 = shalt.err (!%p1386_p8)
}
  0x1d   : > { %s1515_s22 = smov 896   ;;  %s1516_s23 = smov 56  }
  0x1e   : > { %1253 = dma.hbm_to_vmem [thread:$0]  (!%p1618_p12), %s1797_s5, 7168, %s238_s15, [#allocation6], %s1515_s22, %s1515_s22, %s1516_s23  }
  0x1f   : > { %s1401_s9 = scalar_lea.vmem %s228_s18, 16  ;;  %s1408_s14 = scalar_lea.vmem %s228_s18, 32 }
  0x20   : > { %p1402_p11 = scmp.ne.s32.totalorder %s228_s18, %s1401_s9  ;;  %p1409_p9 = scmp.lt.s32.totalorder %s228_s18, %s228_s18 }
  0x21   : > { %p1410_p3 = scmp.lt.s32.totalorder %s1408_s14, %s1401_s9 }
  0x22   : > { %p1404_p0 = pnand %p1402_p11, %p1366_p13 }
  0x23   : > { %p1411_p2 = por %p1410_p3, %p1409_p9 }
  0x24   : > { %p1405_p1 = pneg %p1404_p0 }
  0x26   : > { %p1412_p4 = pnand %p1411_p2, %p1405_p1 }
  0x28   : > { %1415 = shalt.err (!%p1412_p4)
}
  0x29   : > { %1250 = dma.hbm_to_vmem [thread:$0]  (!%p1618_p12), %s1796_s4, 16, %s228_s18, [#allocation3]  }
  0x2a   : > { %s1427_s15 = scalar_lea.vmem %s252_s20, 112  ;;  %s1434_s21 = scalar_lea.vmem %s252_s20, 128 }
  0x2b   : > { %p1428_p7 = scmp.ne.s32.totalorder %s252_s20, %s1427_s15  ;;  %p1435_p0 = scmp.lt.s32.totalorder %s252_s20, %s252_s20 }
  0x2c   : > { %p1436_p6 = scmp.lt.s32.totalorder %s1434_s21, %s1427_s15 }
  0x2d   : > { %p1430_p8 = pnand %p1428_p7, %p1366_p13 }
  0x2e   : > { %p1437_p9 = por %p1436_p6, %p1435_p0 }
  0x2f   : > { %p1431_p11 = pneg %p1430_p8 }
  0x31   : > { %p1438_p1 = pnand %p1437_p9, %p1431_p11 }
  0x33   : > { %1441 = shalt.err (!%p1438_p1)
}
  0x34   : > { %1256 = dma.hbm_to_vmem [thread:$0]  (!%p1618_p12), %s1798_s6, 112, %s252_s20, [#allocation6]  }
  0x35   : > { %281 = sbr.rel (%p1610_p10) target bundleno = 757 (0x2f5), region = 48  ;;  %p1805_p3 = scmp.eq.s32.totalorder (!%p1610_p10), %s1582_s28, 0 }
  0x3a   : > { %1485 = dma.done.wait (%p1805_p3), [#allocation3], 16   ;;  %p1806_p13 = pmov %p1805_p3 }
  0x3b   : > { %p1807_p2 = pmov %p1805_p3 }
  0x3c   : > { %1487 = vsyncadd (%p1806_p13), [#allocation3], 4294967280 }
  0x3d   : > { %1489 = dma.done.wait (%p1807_p2), [#allocation6], 7280   ;;  %p1808_p6 = pmov %p1807_p2 }
  0x3e   : > { %s1659_s16 = sshll.u32 %s1582_s28, 1  ;;  %vm356_vm0 = vcmask 130048   ;;  %v348_v0 = vld [vmem:[%s1793_s1 + $0x8] sm:$0xff]  ;;  %v347_v1 = vld [vmem:[%s1793_s1] sm:$0xff]  ;;  %v443_v4 = vld [vmem:[%s1795_s3 + $0x18] sm:$0xff]  ;;  %vm451_vm1 = vcmask 261120  }
  0x3f   : > { %1491 = vsyncadd (%p1808_p6), [#allocation6], 4294960016  ;;  %p330_p12 = scmp.lt.s32.totalorder %s1659_s16, 2  ;;  %1195 = vmatprep.subr.mxu0 %v348_v0  ;;  %1202 = vmatprep.subr.mxu1 %v443_v4  ;;  %v442_v5 = vld [vmem:[%s1795_s3 + $0x10] sm:$0xff]  ;;  %v441_v6 = vld [vmem:[%s1795_s3 + $0x8] sm:$0xff]  ;;  %v1517_v49 = vmov 0.0  }
  0x40   : > { %1196 = vmatpush3.msra.mxu0 %v348_v0  ;;  %1203 = vmatpush3.msra.mxu1 %v443_v4  ;;  %v440_v7 = vld [vmem:[%s1795_s3] sm:$0xff]  ;;  %v585_v8 = vld [vmem:[#allocation5 + $0x190] sm:$0xff]  ;;  %v584_v10 = vld [vmem:[#allocation5 + $0x188] sm:$0xff]  ;;  %vm628_vm2 = vcmask 523264   ;;  %s322_s14 = sand.u32 1, %s1502_s25   ;;  %s1034_s21 = ssub.s32 (%p1599_p5), 3, %s1659_s16 }
  0x41   : > { %s331_s13 = scalar_select %p330_p12, %s1659_s16, 2  ;;  %1197 = vmatprep.subr.mxu0 %v347_v1  ;;  %1204 = vmatprep.subr.mxu1 %v442_v5  ;;  %v587_v9 = vld [vmem:[#allocation5 + $0x1a0] sm:$0xff]  ;;  %v578_v11 = vld [vmem:[#allocation5 + $0x158] sm:$0xff]  ;;  %v577_v12 = vld [vmem:[#allocation5 + $0x150] sm:$0xff] }
  0x42   : > { %1198 = vmatpush3.msra.mxu0 %v347_v1  ;;  %1205 = vmatpush3.msra.mxu1 %v442_v5  ;;  %v571_v13 = vld [vmem:[#allocation5 + $0x120] sm:$0xff]  ;;  %v570_v14 = vld [vmem:[#allocation5 + $0x118] sm:$0xff]  ;;  %v564_v15 = vld [vmem:[#allocation5 + $0xe8] sm:$0xff]  ;;  %s1232_s17 = smul.u32 112, %s322_s14  ;;  %s1732_s15 = scalar_lea.sflag [#allocation4], %s322_s14 }
  0x43   : > { %s1151_s18 = sshll.u32 %s331_s13, 3  ;;  %1206 = vmatprep.subr.mxu1 %v441_v6  ;;  %651 = vmatprep.subr.mxu0 %v585_v8  ;;  %v563_v16 = vld [vmem:[#allocation5 + $0xe0] sm:$0xff]  ;;  %v557_v17 = vld [vmem:[#allocation5 + $0xb0] sm:$0xff]  ;;  %v556_v18 = vld [vmem:[#allocation5 + $0xa8] sm:$0xff]  ;;  %p1035_p10 = scmp.lt.s32.totalorder (%p1599_p5), %s1034_s21, 2 }
  0x44   : > { %s333_s8 = scalar_lea.vmem %s1792_s0, %s1151_s18  ;;  %1207 = vmatpush3.msra.mxu1 %v441_v6  ;;  %v1152_v19 = vld [vmem:[%s1794_s2] ss:$0 sm:$0xff]  ;;  %v580_v27 = vld [vmem:[#allocation5 + $0x168] sm:$0xff]  ;;  %v579_v28 = vld [vmem:[#allocation5 + $0x160] sm:$0xff]  ;;  %s1712_s19 = scalar_lea.vmem [#allocation8], %s1232_s17 }
  0x45   : > { %v345_v2 = vld [vmem:[%s333_s8] sm:$0xff]  ;;  %v346_v3 = vld [vmem:[%s333_s8 + $0x8] sm:$0xff]  ;;  %1208 = vmatprep.subr.mxu1 %v440_v7  ;;  %v573_v29 = vld [vmem:[#allocation5 + $0x130] sm:$0xff] }
  0x46   : > { %1199 = vmatprep.mubr.msk.f32.mxu0 %vm356_vm0, %v345_v2  ;;  %1209 = vmatpush3.msra.mxu1 %v440_v7  ;;  %v586_v26 = vld [vmem:[#allocation5 + $0x198] sm:$0xff]  ;;  %v572_v30 = vld [vmem:[#allocation5 + $0x128] sm:$0xff]  ;;  %v565_v32 = vld [vmem:[#allocation5 + $0xf0] sm:$0xff] }
  0x47   : > { %1200 = vmatmul.mubr.msk.f32.vlgmr.msra.gmra.mxu0 %vm356_vm0, %v346_v3  ;;  %728 = vmatprep.subr.mxu1 %v587_v9  ;;  %v566_v31 = vld [vmem:[#allocation5 + $0xf8] sm:$0xff]  ;;  %v559_v33 = vld [vmem:[#allocation5 + $0xc0] sm:$0xff]  ;;  %v552_v36 = vld [vmem:[#allocation5 + $0x88] sm:$0xff] }
  0x48   : > { %652 = vmatpush1.msra.mxu0 %v584_v10  ;;  %v558_v34 = vld [vmem:[#allocation5 + $0xb8] sm:$0xff]  ;;  %v549_v37 = vld [vmem:[#allocation5 + $0x70] sm:$0xff]  ;;  %v551_v38 = vld [vmem:[#allocation5 + $0x80] sm:$0xff]  ;;  %699 = vmatprep.mubr.f32.mxu0 %v1517_v49 }
  0x49   : > { %653 = vmatprep.subr.mxu0 %v578_v11  ;;  %v550_v35 = vld [vmem:[#allocation5 + $0x78] sm:$0xff]  ;;  %v543_v39 = vld [vmem:[#allocation5 + $0x40] sm:$0xff]  ;;  %v545_v40 = vld [vmem:[#allocation5 + $0x50] sm:$0xff] }
  0x4a   : > { %654 = vmatpush1.msra.mxu0 %v577_v12  ;;  %v542_v41 = vld [vmem:[#allocation5 + $0x38] sm:$0xff]  ;;  %v544_v42 = vld [vmem:[#allocation5 + $0x48] sm:$0xff]  ;;  %v535_v45 = vld [vmem:[#allocation5] sm:$0xff] }
  0x4b   : > { %655 = vmatprep.subr.mxu0 %v571_v13  ;;  %v536_v43 = vld [vmem:[#allocation5 + $0x8] sm:$0xff]  ;;  %v538_v44 = vld [vmem:[#allocation5 + $0x18] sm:$0xff]  ;;  %v537_v46 = vld [vmem:[#allocation5 + $0x10] sm:$0xff] }
  0x4c   : > { %656 = vmatpush1.msra.mxu0 %v570_v14  ;;  %v589_v47 = vld [vmem:[#allocation5 + $0x1b0] sm:$0xff]  ;;  %v590_v48 = vld [vmem:[#allocation5 + $0x1b8] sm:$0xff]  ;;  %v588_v55 = vld [vmem:[#allocation5 + $0x1a8] sm:$0xff] }
  0x4d   : > { %657 = vmatprep.subr.mxu0 %v564_v15  ;;  %v1155_v51 = vld [vmem:[#allocation2] ss:$0 sm:$0xff]  ;;  %v583_v57 = vld [vmem:[#allocation5 + $0x180] sm:$0xff]  ;;  %v581_v59 = vld [vmem:[#allocation5 + $0x170] sm:$0xff]  ;;  %v593_v15 = vlaneseq }
  0x4e   : > { %658 = vmatpush1.msra.mxu0 %v563_v16  ;;  %v582_v56 = vld [vmem:[#allocation5 + $0x178] sm:$0xff]  ;;  %v575_v60 = vld [vmem:[#allocation5 + $0x140] sm:$0xff]  ;;  %v576_v61 = vld [vmem:[#allocation5 + $0x148] sm:$0xff] }
  0x4f   : > { %659 = vmatprep.subr.mxu0 %v557_v17  ;;  %v574_v63 = vld [vmem:[#allocation5 + $0x138] sm:$0xff]  ;;  %v568_v0 = vld [vmem:[#allocation5 + $0x108] sm:$0xff]  ;;  %v569_v1 = vld [vmem:[#allocation5 + $0x110] sm:$0xff]  ;;  %v594_v16 = vshrl.u32 %v593_v15, 7 }
  0x50   : > { %660 = vmatpush1.msra.mxu0 %v556_v18  ;;  %v567_v2 = vld [vmem:[#allocation5 + $0x100] sm:$0xff]  ;;  %v561_v3 = vld [vmem:[#allocation5 + $0xd0] sm:$0xff]  ;;  %v562_v4 = vld [vmem:[#allocation5 + $0xd8] sm:$0xff] }
  0x51   : > { %661 = vmatprep.subr.mxu0 %v550_v35  ;;  %v560_v5 = vld [vmem:[#allocation5 + $0xc8] sm:$0xff]  ;;  %v554_v6 = vld [vmem:[#allocation5 + $0x98] sm:$0xff]  ;;  %v555_v7 = vld [vmem:[#allocation5 + $0xa0] sm:$0xff]  ;;  %v595_v17 = vsub.s32 0, %v594_v16  ;;  %v603_v18 = vsub.s32 2, %v594_v16 }
  0x52   : > { %662 = vmatpush1.msra.mxu0 %v549_v37  ;;  %v553_v8 = vld [vmem:[#allocation5 + $0x90] sm:$0xff]  ;;  %v547_v9 = vld [vmem:[#allocation5 + $0x60] sm:$0xff]  ;;  %v548_v10 = vld [vmem:[#allocation5 + $0x68] sm:$0xff] }
  0x53   : > { %663 = vmatprep.subr.mxu0 %v543_v39  ;;  %v546_v11 = vld [vmem:[#allocation5 + $0x58] sm:$0xff]  ;;  %v540_v12 = vld [vmem:[#allocation5 + $0x28] sm:$0xff]  ;;  %v541_v13 = vld [vmem:[#allocation5 + $0x30] sm:$0xff] }
  0x54   : > { %664 = vmatpush1.msra.mxu0 %v542_v41  ;;  %v539_v14 = vld [vmem:[#allocation5 + $0x20] sm:$0xff] }
  0x55   : > { %665 = vmatprep.subr.mxu0 %v536_v43 }
  0x56   : > { %666 = vmatpush1.msra.mxu0 %v535_v45 }
  0x57   : > { %805 = vmatprep.subr.mxu0 %v589_v47 }
 0x107   : > { %v1201_v20 = vpop.f32.mrf.mxu0 }
 0x108   : > { %v435_v21 = vadd.f32 %v1201_v20, %v1152_v19  ;;  %v599_v20 = vsub.s32 1, %v594_v16 }
 0x109   : > { %v429_v22 = vpop.f32.mrf.mxu0 }
 0x10a   : > { %v430_v23 = vadd.f32 %v1152_v19, %v429_v22  ;;  %v439_v25 = vmax.f32 %v435_v21, 0.0  ;;  %v591_v19 = vld [vmem:[#allocation7] sm:$0x7f]  ;;  %v607_v21 = vsub.s32 3, %v594_v16 }
 0x10b   : > { %v596_v22 = vrot.slane %v591_v19, %v595_v17 }
 0x10c   : > { %v438_v24 = vmax.f32 %v430_v23, 0.0  ;;  %v604_v23 = vrot.slane %v591_v19, %v603_v18 }
 0x10e   : > { %1210 = vmatprep.mubr.msk.f32.mxu1 %vm451_vm1, %v438_v24  ;;  %v600_v24 = vrot.slane %v591_v19, %v599_v20 }
 0x10f   : > { %1211 = vmatmul.mubr.msk.f32.vlgmr.msra.gmra.mxu1 %vm451_vm1, %v439_v25  ;;  %v608_v25 = vrot.slane %v591_v19, %v607_v21 }
 0x110   : > { %729 = vmatpush1.msra.mxu1 %v586_v26  ;;  %776 = vmatprep.mubr.f32.mxu1 %v1517_v49 }
 0x111   : > { %730 = vmatprep.subr.mxu1 %v580_v27 }
 0x112   : > { %731 = vmatpush1.msra.mxu1 %v579_v28 }
 0x113   : > { %732 = vmatprep.subr.mxu1 %v573_v29 }
 0x114   : > { %733 = vmatpush1.msra.mxu1 %v572_v30 }
 0x115   : > { %734 = vmatprep.subr.mxu1 %v566_v31 }
 0x116   : > { %735 = vmatpush1.msra.mxu1 %v565_v32 }
 0x117   : > { %736 = vmatprep.subr.mxu1 %v559_v33 }
 0x118   : > { %737 = vmatpush1.msra.mxu1 %v558_v34 }
 0x119   : > { %738 = vmatprep.subr.mxu1 %v552_v36 }
 0x11a   : > { %739 = vmatpush1.msra.mxu1 %v551_v38 }
 0x11b   : > { %740 = vmatprep.subr.mxu1 %v545_v40 }
 0x11c   : > { %741 = vmatpush1.msra.mxu1 %v544_v42 }
 0x11d   : > { %742 = vmatprep.subr.mxu1 %v538_v44 }
 0x11e   : > { %743 = vmatpush1.msra.mxu1 %v537_v46 }
 0x11f   : > { %1213 = vmatprep.subr.mxu1 %v590_v48 }
 0x1cf   : > { %v1212_v50 = vpop.f32.mrf.mxu1 }
 0x1d0   : > { %v530_v58 = vadd.f32 %v1212_v50, %v1155_v51 }
 0x1d1   : > { %v524_v52 = vpop.f32.mrf.mxu1 }
 0x1d2   : > { %v525_v53 = vadd.f32 %v1155_v51, %v524_v52  ;;  %v534_v62 = vmax.f32 %v530_v58, 0.0 }
 0x1d4   : > { %v1691_v54 = vmax.f32 %v525_v53, 0.0 }
 0x1d6   : > { %1158 = vmatmul.mubr.msk.f32.vlgmr.msra.gmra.mxu0 %vm628_vm2, %v1691_v54  ;;  %1160 = vmatmul.mubr.msk.f32.vlgmr.msra.gmra.mxu1 %vm628_vm2, %v1691_v54 }
 0x1d7   : > { %806 = vmatpush1.msra.mxu0 %v588_v55  ;;  %1214 = vmatpush3.msra.mxu1 %v590_v48 }
 0x1d8   : > { %807 = vmatprep.subr.mxu0 %v582_v56  ;;  %1215 = vmatprep.subr.mxu1 %v583_v57  ;;  %v611_v56 = vsub.s32 4, %v594_v16 }
 0x1d9   : > { %808 = vmatpush1.msra.mxu0 %v581_v59  ;;  %1216 = vmatpush3.msra.mxu1 %v583_v57  ;;  %v619_v57 = vsub.s32 6, %v594_v16 }
 0x1da   : > { %705 = vmatprep.mubr.f32.mxu0 %v1517_v49  ;;  %782 = vmatprep.mubr.f32.mxu1 %v1517_v49 }
 0x1db   : > { %809 = vmatprep.subr.mxu0 %v575_v60  ;;  %1217 = vmatprep.subr.mxu1 %v576_v61  ;;  %v615_v60 = vsub.s32 5, %v594_v16 }
 0x1dc   : > { %1159 = vmatmul.mubr.msk.f32.gmra.mxu0 %vm628_vm2, %v534_v62  ;;  %1161 = vmatmul.mubr.msk.f32.gmra.mxu1 %vm628_vm2, %v534_v62 }
 0x1dd   : > { %810 = vmatpush1.msra.mxu0 %v574_v63  ;;  %1218 = vmatpush3.msra.mxu1 %v576_v61  ;;  %v612_v61 = vrot.slane %v591_v19, %v611_v56  ;;  %v616_v63 = vrot.slane %v591_v19, %v615_v60 }
 0x1de   : > { %811 = vmatprep.subr.mxu0 %v568_v0  ;;  %1219 = vmatprep.subr.mxu1 %v569_v1 }
 0x1df   : > { %1229 = vmatprep.mubr.msk.f32.mxu1 %vm628_vm2, %v1691_v54  ;;  %812 = vmatpush1.msra.mxu0 %v567_v2 }
 0x1e0   : > { %1220 = vmatpush3.msra.mxu1 %v569_v1  ;;  %813 = vmatprep.subr.mxu0 %v561_v3 }
 0x1e1   : > { %1221 = vmatprep.subr.mxu1 %v562_v4  ;;  %814 = vmatpush1.msra.mxu0 %v560_v5 }
 0x1e2   : > { %1222 = vmatpush3.msra.mxu1 %v562_v4  ;;  %815 = vmatprep.subr.mxu0 %v554_v6 }
 0x1e3   : > { %1223 = vmatprep.subr.mxu1 %v555_v7  ;;  %816 = vmatpush1.msra.mxu0 %v553_v8 }
 0x1e4   : > { %1224 = vmatpush3.msra.mxu1 %v555_v7  ;;  %817 = vmatprep.subr.mxu0 %v547_v9 }
 0x1e5   : > { %1225 = vmatprep.subr.mxu1 %v548_v10  ;;  %818 = vmatpush1.msra.mxu0 %v546_v11 }
 0x1e6   : > { %1226 = vmatpush3.msra.mxu1 %v548_v10  ;;  %819 = vmatprep.subr.mxu0 %v540_v12 }
 0x1e7   : > { %1227 = vmatprep.subr.mxu1 %v541_v13  ;;  %820 = vmatpush1.msra.mxu0 %v539_v14 }
 0x1e8   : > { %853 = vmatprep.mubr.f32.mxu0 %v1517_v49  ;;  %1228 = vmatpush3.msra.mxu1 %v541_v13 }
 0x1e9   : > { %1162 = vmatmul.mubr.msk.f32.vlgmr.msra.gmra.mxu0 %vm628_vm2, %v1691_v54  ;;  %1230 = vmatmul.mubr.msk.f32.vlgmr.msra.gmra.mxu1 %vm628_vm2, %v534_v62 }
 0x1ea   : > { %859 = vmatprep.mubr.f32.mxu0 %v1517_v49 }
 0x1ed   : > { %1163 = vmatmul.mubr.msk.f32.gmra.mxu0 %vm628_vm2, %v534_v62  ;;  %v620_v62 = vrot.slane %v591_v19, %v619_v57 }
 0x296   : > { %v701_v26 = vpop.f32.mrf.mxu0  ;;  %v778_v27 = vpop.f32.mrf.mxu1 }
 0x297   : > { %v702_v28 = vadd.f32 %v701_v26, %v596_v22  ;;  %v779_v29 = vadd.f32 %v778_v27, %v604_v23 }
 0x298   : > { %v703_v30 = vpop.f32.mrf.mxu0  ;;  %v780_v31 = vpop.f32.mrf.mxu1 }
 0x299   : > { %v941_v32 = vsub.f32 0.0, %v702_v28  ;;  %v943_v33 = vsub.f32 0.0, %v779_v29  ;;  %v704_v34 = vadd.f32 %v703_v30, %v600_v24  ;;  %v781_v35 = vadd.f32 %v780_v31, %v608_v25 }
 0x29b   : > { %v955_v36 = vmul.f32 1.442695, %v941_v32  ;;  %v959_v37 = vmul.f32 1.442695, %v943_v33  ;;  %v942_v38 = vsub.f32 0.0, %v704_v34  ;;  %v944_v39 = vsub.f32 0.0, %v781_v35 }
 0x29c   : > { %v707_v40 = vpop.f32.mrf.mxu0  ;;  %v784_v41 = vpop.f32.mrf.mxu1 }
 0x29d   : > { %1308 = vpow2.f32 %v955_v36  ;;  %v957_v42 = vmul.f32 1.442695, %v942_v38  ;;  %v961_v43 = vmul.f32 1.442695, %v944_v39  ;;  %v708_v44 = vadd.f32 %v707_v40, %v596_v22 }
 0x29e   : > { %1310 = vpow2.f32 %v959_v37  ;;  %v785_v45 = vadd.f32 %v784_v41, %v604_v23  ;;  %v709_v46 = vpop.f32.mrf.mxu0  ;;  %v786_v47 = vpop.f32.mrf.mxu1 }
 0x29f   : > { %1312 = vpow2.f32 %v957_v42  ;;  %v948_v48 = vsub.f32 0.0, %v708_v44  ;;  %v710_v49 = vadd.f32 %v709_v46, %v600_v24  ;;  %v787_v50 = vadd.f32 %v786_v47, %v608_v25 }
 0x2a0   : > { %1314 = vpow2.f32 %v961_v43  ;;  %v950_v51 = vsub.f32 0.0, %v785_v45 }
 0x2a1   : > { %v969_v52 = vmul.f32 1.442695, %v948_v48  ;;  %v949_v53 = vsub.f32 0.0, %v710_v49  ;;  %v951_v54 = vsub.f32 0.0, %v787_v50 }
 0x2a2   : > { %v973_v55 = vmul.f32 1.442695, %v950_v51 }
 0x2a3   : > { %1316 = vpow2.f32 %v969_v52  ;;  %v971_v58 = vmul.f32 1.442695, %v949_v53  ;;  %v975_v59 = vmul.f32 1.442695, %v951_v54 }
 0x2a4   : > { %1318 = vpow2.f32 %v973_v55 }
 0x2a5   : > { %1320 = vpow2.f32 %v971_v58 }
 0x2a6   : > { %1322 = vpow2.f32 %v975_v59 }
 0x2a9   : > { %v855_v0 = vpop.f32.mrf.mxu0  ;;  %v1231_v1 = vpop.f32.mrf.mxu1 }
 0x2aa   : > { %v1309_v2 = vpop.eup %1308  ;;  %v856_v3 = vadd.f32 %v855_v0, %v612_v61  ;;  %v938_v4 = vadd.f32 %v1231_v1, %v620_v62 }
 0x2ab   : > { %v1311_v5 = vpop.eup %1310  ;;  %v983_v6 = vadd.f32 1.0, %v1309_v2  ;;  %v857_v7 = vpop.f32.mrf.mxu0 }
 0x2ac   : > { %v932_v8 = vpop.f32.mrf.mxu1  ;;  %v1313_v9 = vpop.eup %1312  ;;  %v985_v10 = vadd.f32 1.0, %v1311_v5  ;;  %v945_v11 = vsub.f32 0.0, %v856_v3  ;;  %v954_v12 = vsub.f32 0.0, %v938_v4  ;;  %v858_v13 = vadd.f32 %v857_v7, %v616_v63 }
 0x2ad   : > { %v1315_v14 = vpop.eup %1314  ;;  %1324 = vrcp.f32 %v983_v6  ;;  %v984_v15 = vadd.f32 1.0, %v1313_v9  ;;  %v933_v16 = vadd.f32 %v932_v8, %v620_v62  ;;  %v861_v17 = vpop.f32.mrf.mxu0 }
 0x2ae   : > { %1326 = vrcp.f32 %v985_v10  ;;  %v986_v18 = vadd.f32 1.0, %v1315_v14  ;;  %v963_v19 = vmul.f32 1.442695, %v945_v11  ;;  %v981_v20 = vmul.f32 1.442695, %v954_v12 }
 0x2af   : > { %1328 = vrcp.f32 %v984_v15  ;;  %v946_v21 = vsub.f32 0.0, %v858_v13  ;;  %v862_v22 = vadd.f32 %v861_v17, %v612_v61  ;;  %v863_v23 = vpop.f32.mrf.mxu0  ;;  %v947_v25 = vsub.f32 0.0, %v933_v16 }
 0x2b0   : > { %v1317_v24 = vpop.eup %1316  ;;  %1330 = vrcp.f32 %v986_v18  ;;  %v864_v26 = vadd.f32 %v863_v23, %v616_v63 }
 0x2b1   : > { %v1319_v27 = vpop.eup %1318  ;;  %v990_v28 = vadd.f32 1.0, %v1317_v24  ;;  %1332 = vpow2.f32 %v963_v19  ;;  %v952_v31 = vsub.f32 0.0, %v862_v22  ;;  %v965_v35 = vmul.f32 1.442695, %v946_v21 }
 0x2b2   : > { %v1321_v29 = vpop.eup %1320  ;;  %v992_v30 = vadd.f32 1.0, %v1319_v27  ;;  %1334 = vpow2.f32 %v981_v20  ;;  %v953_v32 = vsub.f32 0.0, %v864_v26  ;;  %v967_v37 = vmul.f32 1.442695, %v947_v25 }
 0x2b3   : > { %v1323_v33 = vpop.eup %1322  ;;  %1336 = vrcp.f32 %v990_v28  ;;  %v991_v34 = vadd.f32 1.0, %v1321_v29  ;;  %v977_v38 = vmul.f32 1.442695, %v952_v31 }
 0x2b4   : > { %1338 = vrcp.f32 %v992_v30  ;;  %v993_v36 = vadd.f32 1.0, %v1323_v33  ;;  %v979_v39 = vmul.f32 1.442695, %v953_v32 }
 0x2b5   : > { %1340 = vrcp.f32 %v991_v34 }
 0x2b6   : > { %1342 = vrcp.f32 %v993_v36 }
 0x2b7   : > { %1344 = vpow2.f32 %v965_v35 }
 0x2b8   : > { %1346 = vpow2.f32 %v967_v37 }
 0x2b9   : > { %1348 = vpow2.f32 %v977_v38 }
 0x2ba   : > { %v1325_v40 = vpop.eup %1324  ;;  %1350 = vpow2.f32 %v979_v39 }
 0x2bb   : > { %v1327_v41 = vpop.eup %1326  ;;  %1011 = vst [vmem:[%s1712_s19] sm:$0xff] %v1325_v40 }
 0x2bc   : > { %v1329_v42 = vpop.eup %1328  ;;  %1013 = vst [vmem:[%s1712_s19 + $0x10] sm:$0xff] %v1327_v41 }
 0x2bd   : > { %v1331_v43 = vpop.eup %1330  ;;  %1012 = vst [vmem:[%s1712_s19 + $0x8] sm:$0xff] %v1329_v42 }
 0x2be   : > { %v1333_v44 = vpop.eup %1332  ;;  %1014 = vst [vmem:[%s1712_s19 + $0x18] sm:$0xff] %v1331_v43 }
 0x2bf   : > { %v1335_v45 = vpop.eup %1334  ;;  %v987_v46 = vadd.f32 1.0, %v1333_v44 }
 0x2c0   : > { %v1337_v47 = vpop.eup %1336  ;;  %v996_v48 = vadd.f32 1.0, %v1335_v45 }
 0x2c1   : > { %v1339_v49 = vpop.eup %1338  ;;  %1018 = vst [vmem:[%s1712_s19 + $0x38] sm:$0xff] %v1337_v47  ;;  %1352 = vrcp.f32 %v987_v46 }
 0x2c2   : > { %v1341_v50 = vpop.eup %1340  ;;  %1020 = vst [vmem:[%s1712_s19 + $0x48] sm:$0xff] %v1339_v49  ;;  %1354 = vrcp.f32 %v996_v48 }
 0x2c3   : > { %v1343_v51 = vpop.eup %1342  ;;  %1019 = vst [vmem:[%s1712_s19 + $0x40] sm:$0xff] %v1341_v50 }
 0x2c4   : > { %v1345_v52 = vpop.eup %1344  ;;  %1021 = vst [vmem:[%s1712_s19 + $0x50] sm:$0xff] %v1343_v51 }
 0x2c5   : > { %v1347_v53 = vpop.eup %1346  ;;  %v988_v54 = vadd.f32 1.0, %v1345_v52 }
 0x2c6   : > { %v1349_v55 = vpop.eup %1348  ;;  %v989_v56 = vadd.f32 1.0, %v1347_v53 }
 0x2c7   : > { %v1351_v57 = vpop.eup %1350  ;;  %1356 = vrcp.f32 %v988_v54  ;;  %v994_v58 = vadd.f32 1.0, %v1349_v55 }
 0x2c8   : > { %1358 = vrcp.f32 %v989_v56  ;;  %v995_v59 = vadd.f32 1.0, %v1351_v57 }
 0x2c9   : > { %1360 = vrcp.f32 %v994_v58 }
 0x2ca   : > { %1362 = vrcp.f32 %v995_v59 }
 0x2ce   : > { %v1353_v60 = vpop.eup %1352 }
 0x2cf   : > { %v1355_v61 = vpop.eup %1354  ;;  %1015 = vst [vmem:[%s1712_s19 + $0x20] sm:$0xff] %v1353_v60 }
 0x2d0   : > { %1024 = vst.msk [vmem:[%s1712_s19 + $0x68] sm:$0xff] %vm356_vm0, %v1355_v61 }
 0x2d4   : > { %v1357_v62 = vpop.eup %1356  ;;  %1032 = sbr.rel (!%p1599_p5) target bundleno = 757 (0x2f5), region = 64 }
 0x2d5   : > { %v1359_v63 = vpop.eup %1358  ;;  %1016 = vst [vmem:[%s1712_s19 + $0x28] sm:$0xff] %v1357_v62 }
 0x2d6   : > { %v1361_v0 = vpop.eup %1360  ;;  %1017 = vst.msk [vmem:[%s1712_s19 + $0x30] sm:$0xff] %vm356_vm0, %v1359_v63 }
 0x2d7   : > { %v1363_v1 = vpop.eup %1362  ;;  %1022 = vst [vmem:[%s1712_s19 + $0x58] sm:$0xff] %v1361_v0 }
 0x2d8   : > { %1023 = vst [vmem:[%s1712_s19 + $0x60] sm:$0xff] %v1363_v1 }
 0x2d9   : > { %s1815_s21 = smov (!%p1035_p10, %s1034_s21), 2 }
 0x2da   : > { %s1737_s22 = smul.u32 896, %s1815_s21 }
 0x2dc   : > { %s1040_s23 = ssub.s32 1792, %s1737_s22 }
 0x2dd   : > { %1041 = vsyncadd %s1732_s15, %s1040_s23  ;;  %p1169_p4 = scmp.ne.s32.totalorder %s1737_s22, 0  ;;  %s1233_s13 = smul.u32 1792, %s1582_s28 }
 0x2de   : > { %s1047_s18 = sshll.u32 %s1712_s19, 4  ;;  %s1518_s8 = smov [#allocation8]   ;;  %s1749_s18 = int_to_ptr.vmem [resolvable:$true] %s1047_s18 }
 0x2df   : > { %s1747_s29 = scalar_lea.hbm %s1799_s7, %s1233_s13  ;;  %s1442_s16 = scalar_lea.vmem %s1749_s18, %s1737_s22 }
 0x2e0   : > { %p1443_p5 = scmp.ne.s32.totalorder %s1749_s18, %s1442_s16  ;;  %s1446_s9 = sshll.u32 %s1518_s8, 4  ;;  %s1447_s9 = int_to_ptr.vmem [resolvable:$false] %s1446_s9 }
 0x2e1   : > { %s1448_s28 = scalar_lea.vmem %s1447_s9, 3584  ;;  %p1449_p11 = scmp.lt.s32.totalorder %s1749_s18, %s1447_s9 }
 0x2e2   : > { %p1444_p7 = pnand %p1443_p5, %p1169_p4  ;;  %p1450_p0 = scmp.lt.s32.totalorder %s1448_s28, %s1442_s16 }
 0x2e4   : > { %p1445_p8 = pneg %p1444_p7  ;;  %p1451_p9 = por %p1450_p0, %p1449_p11 }
 0x2e6   : > { %p1452_p1 = pnand %p1451_p9, %p1445_p8 }
 0x2e8   : > { %1455 = shalt.err (!%p1452_p1)
}
 0x2e9   : > { %s1456_s14 = scalar_lea.hbm %s1747_s29, %s1737_s22  ;;  %s1460_s21 = scalar_lea.hbm %s1799_s7, 2688 }
 0x2ea   : > { %p1457_p3 = scmp.ne.s32.totalorder %s1747_s29, %s1456_s14  ;;  %p1461_p6 = scmp.lt.s32.totalorder %s1747_s29, %s1799_s7 }
 0x2eb   : > { %p1462_p12 = scmp.lt.s32.totalorder %s1460_s21, %s1456_s14 }
 0x2ec   : > { %p1458_p13 = pnand %p1457_p3, %p1169_p4 }
 0x2ed   : > { %p1463_p10 = por %p1462_p12, %p1461_p6 }
 0x2ee   : > { %p1459_p2 = pneg %p1458_p13 }
 0x2f0   : > { %p1464_p5 = pnand %p1463_p10, %p1459_p2 }
 0x2f2   : > { %1467 = shalt.err (!%p1464_p5)
}
 0x2f3   : > { %s1519_s11 = smov 896   ;;  %s1520_s20 = smov 56  }
 0x2f4   : > { %1053 = dma.vmem_to_hbm [thread:$0]  (%p1169_p4), %s1749_s18, %s1737_s22, %s1747_s29, %s1732_s15, %s1519_s11, %s1519_s11, %s1520_s20  }
 0x2f5 PF: > { %p1267_p7 = scmp.ge.s32.totalorder %s1510_s27, 2  ;;  %s1062_s16 = sand.u32 1, %s1498_s24  }
 0x2f6   : > { %p1809_p8 = scmp.ne.s32.totalorder %s1802_s12, 0  ;;  %s1063_s8 = scalar_lea.sflag [#allocation4], %s1062_s16 }
 0x2f8   : > { %p1258_p11 = pnand %p1267_p7, %p1809_p8 }
 0x2fa   : > { %p1259_p0 = pneg %p1258_p11 }
 0x2fc   : > { %1493 = dma.done.wait (%p1259_p0), %s1063_s8, 1792  }
 0x2fd   : > { %1495 = vsyncadd (%p1259_p0), %s1063_s8, 4294965504  ;;  %p19_p9 = scmp.ge.s32.totalorder %s1586_s30, 4   ;;  %s1810_s24 = smov %s1502_s25 }
 0x2fe   : > { %s1811_s25 = smov %s1506_s26  ;;  %s1812_s26 = smov %s1597_s10 }
 0x2ff   : > { %s1813_s27 = smov %s1586_s30  ;;  %21 = sbr.rel (!%p19_p9) target bundleno = 5 (0x5), region = 96 }
 0x304   :  { %1068 = vsyncpa [#allocation3], 1 }
 0x305   :  { %1070 = vsyncpa [#allocation3 + $0x1], 1 }
 0x306   :  { %1071 = vsyncpa [#allocation6], 1 }
 0x307   :  { %1072 = vsyncpa [#allocation4], 1 }
 0x308   :  { %1074 = vsyncpa [#allocation4 + $0x1], 1 }

</bundles_post_ra>
